<compile_context>
chip_gen: v7x
topology: tpu7x:2x2x1
jax: 0.10.0
libtpu: 0.0.40
codegen_flags: <defaults>
</compile_context>

<pallas_src>
import jax
import jax.numpy as jnp
from jax.experimental import pallas as pl
from jax.experimental.pallas import tpu as pltpu


def _time_embedding_kernel(x_ref, w1_ref, b1_ref, w2_ref, b2_ref, o_ref):
    # Linear 1 + SiLU.  x is f32, w1 is bf16 storage up-cast to f32 so the
    # first matmul is fully f32-accurate given the (already rounded) weights.
    h = jnp.dot(x_ref[...], w1_ref[...].astype(jnp.float32),
                preferred_element_type=jnp.float32)
    h = h + b1_ref[...]                       # f32 bias add
    h = h * jax.nn.sigmoid(h)                 # SiLU in f32 (v5e-safe)
    # Linear 2, restricted to this tile's tn output columns of w2 (bf16 MXU
    # matmul, f32 accumulation).
    out = jnp.dot(h.astype(w2_ref.dtype), w2_ref[...],
                  preferred_element_type=jnp.float32)
    o_ref[...] = (out + b2_ref[...]).astype(o_ref.dtype)


def _pick_tn(hidden: int) -> int:
    """Column-tile width for w2: multiple of 128 dividing `hidden`.

    Prefer exactly 2 tiles (balanced across v7x's two TensorCores); use a
    single full-width tile for small hidden.  Only split further if a single
    (hidden, tn) bf16 tile would blow a conservative VMEM budget -- irrelevant
    at SD shapes where the whole w2 is a few MB.
    """
    assert hidden % 128 == 0, "hidden must be a multiple of 128"
    budget = 8 << 20  # bytes for one (hidden, tn) bf16 w2 tile (pre-buffering)
    if hidden % 256 == 0 and hidden * (hidden // 2) * 2 <= budget:
        return hidden // 2                    # 2 tiles -> 1 per v7x TC
    if hidden * hidden * 2 <= budget:
        return hidden                         # single tile
    # Large-hidden fallback: largest 128-multiple divisor under the budget.
    tn = max((budget // (2 * hidden)) // 128 * 128, 128)
    while hidden % tn != 0:
        tn -= 128
    return tn


def time_embedding(x, w1, b1, w2, b2):
    """Fused TimeEmbedding forward.

    x : (B, n_embed)  float32
    w1: (n_embed, 4*n_embed), b1: (4*n_embed,) or (1, 4*n_embed)
    w2: (4*n_embed, 4*n_embed), b2: (4*n_embed,) or (1, 4*n_embed)
    returns (B, 4*n_embed) float32
    """
    B, n_embed = x.shape
    hidden = 4 * n_embed
    assert w1.shape == (n_embed, hidden)
    assert w2.shape == (hidden, hidden)

    b1 = jnp.asarray(b1, jnp.float32).reshape(1, hidden)
    b2 = jnp.asarray(b2, jnp.float32).reshape(1, hidden)

    # bf16 storage for the bandwidth-dominant operands; f32 accumulate inside.
    x_f = x.astype(jnp.float32)
    w1_bf = w1.astype(jnp.bfloat16)
    w2_bf = w2.astype(jnp.bfloat16)

    # Pad batch up to a full sublane group (8) -> unmasked vector stores.
    # Padded rows produce silu(b1) @ w2 + b2 garbage that is sliced off below.
    b_pad = ((B + 7) // 8) * 8
    if b_pad != B:
        x_f = jnp.pad(x_f, ((0, b_pad - B), (0, 0)))

    tn = _pick_tn(hidden)
    grid = (hidden // tn,)

    # For very large hidden, don't double-buffer the grid-invariant operands
    # and raise the scoped VMEM limit explicitly.  (Never triggers at SD or
    # test shapes, where the defaults are plenty.)
    large = hidden >= 4096
    inv_kw = dict(pipeline_mode=pl.Buffered(1)) if large else {}
    compiler_params = pltpu.CompilerParams(
        dimension_semantics=("parallel",),     # tiles fully independent
        vmem_limit_bytes=(48 << 20) if large else None,
    )

    cost = pl.CostEstimate(
        flops=2 * b_pad * hidden * (n_embed + hidden),
        transcendentals=b_pad * hidden,        # sigmoid per hidden activation
        bytes_accessed=(x_f.size * 4 + w1_bf.size * 2 + w2_bf.size * 2
                        + b1.size * 4 + b2.size * 4 + b_pad * hidden * 4),
    )

    out = pl.pallas_call(
        _time_embedding_kernel,
        out_shape=jax.ShapeDtypeStruct((b_pad, hidden), jnp.float32),
        grid_spec=pltpu.PrefetchScalarGridSpec(
            num_scalar_prefetch=0,
            grid=grid,
            in_specs=[
                # Grid-invariant operands: fetched once, resident in VMEM.
                pl.BlockSpec((b_pad, n_embed), lambda j: (0, 0), **inv_kw),
                pl.BlockSpec((n_embed, hidden), lambda j: (0, 0), **inv_kw),
                pl.BlockSpec((1, hidden), lambda j: (0, 0), **inv_kw),
                # w2 / b2 streamed in tn-wide column tiles (pipelined DMA).
                pl.BlockSpec((hidden, tn), lambda j: (0, j)),
                pl.BlockSpec((1, tn), lambda j: (0, j)),
            ],
            out_specs=pl.BlockSpec((b_pad, tn), lambda j: (0, j)),
        ),
        compiler_params=compiler_params,
        cost_estimate=cost,
    )(x_f, w1_bf, b1, w2_bf, b2)

    return out[:B] if b_pad != B else out


def _reference(x, w1, b1, w2, b2):
    h = x @ w1 + b1.reshape(1, -1)
    h = h * jax.nn.sigmoid(h)
    return h @ w2 + b2.reshape(1, -1)


if __name__ == "__main__":
    root = jax.random.PRNGKey(0)

    def run_case(case_idx: int, B: int, n_embed: int):
        hidden = 4 * n_embed
        key = jax.random.fold_in(root, case_idx)
        kx, kw1, kb1, kw2, kb2 = jax.random.split(key, 5)

        # Deterministic synthetic parameters (PyTorch-like uniform init scale).
        bound1 = 1.0 / (n_embed ** 0.5)
        bound2 = 1.0 / (hidden ** 0.5)
        x = jax.random.normal(kx, (B, n_embed), dtype=jnp.float32)
        w1 = jax.random.uniform(kw1, (n_embed, hidden), jnp.float32, -bound1, bound1)
        b1 = jax.random.uniform(kb1, (1, hidden), jnp.float32, -bound1, bound1)
        w2 = jax.random.uniform(kw2, (hidden, hidden), jnp.float32, -bound2, bound2)
        b2 = jax.random.uniform(kb2, (1, hidden), jnp.float32, -bound2, bound2)

        out = time_embedding(x, w1, b1, w2, b2)
        out = jax.block_until_ready(out)

        ref = _reference(x, w1, b1, w2, b2)
        assert out.shape == (B, hidden)
        # Tolerance covers bf16 storage of w1/w2 and the h -> bf16 cast.
        assert jnp.allclose(out, ref, atol=2e-2, rtol=2e-2), (
            f"mismatch vs reference (case {case_idx})")

    # Case 0: n_embed=32 -> hidden=128 -> single w2 tile (grid of 1).
    run_case(0, B=2, n_embed=32)
    # Case 1: n_embed=64 -> hidden=256 -> two balanced w2 tiles (grid of 2,
    # exercises the "parallel" 2-TensorCore path used at SD shapes).
    run_case(1, B=2, n_embed=64)

    print("KERNEL_OK")
</pallas_src>

<mosaic_0001>
module attributes {stable_mosaic.version = 11 : i64} {
  func.func @_time_embedding_kernel(%arg0: i32, %arg1: memref<8x32xf32, #tpu.memory_space<vmem>>, %arg2: memref<32x128xbf16, #tpu.memory_space<vmem>>, %arg3: memref<1x128xf32, #tpu.memory_space<vmem>>, %arg4: memref<128x128xbf16, #tpu.memory_space<vmem>>, %arg5: memref<1x128xf32, #tpu.memory_space<vmem>>, %arg6: memref<8x128xf32, #tpu.memory_space<vmem>>) attributes {dimension_semantics = [#tpu.dimension_semantics<parallel>], iteration_bounds = array<i64: 1>, scalar_prefetch = 0 : i64, scratch_operands = 0 : i64, tpu.core_type = #tpu.core_type<tc>, window_params = [{pipeline_mode = #tpu.pipeline_mode<synchronous>, transform_indices = @transform_0, window_bounds = array<i64: 8, 32>}, {pipeline_mode = #tpu.pipeline_mode<synchronous>, transform_indices = @transform_1, window_bounds = array<i64: 32, 128>}, {pipeline_mode = #tpu.pipeline_mode<synchronous>, transform_indices = @transform_2, window_bounds = array<i64: 1, 128>}, {transform_indices = @transform_3, window_bounds = array<i64: 128, 128>}, {transform_indices = @transform_4, window_bounds = array<i64: 1, 128>}, {transform_indices = @transform_5, window_bounds = array<i64: 8, 128>}]} {
    %c0 = arith.constant 0 : index
    %c0_0 = arith.constant 0 : index
    %0 = vector.load %arg1[%c0, %c0_0] : memref<8x32xf32, #tpu.memory_space<vmem>>, vector<8x32xf32>
    %c0_1 = arith.constant 0 : index
    %c0_2 = arith.constant 0 : index
    %1 = vector.load %arg2[%c0_1, %c0_2] : memref<32x128xbf16, #tpu.memory_space<vmem>>, vector<32x128xbf16>
    %2 = arith.extf %1 : vector<32x128xbf16> to vector<32x128xf32>
    %cst = arith.constant dense<0.000000e+00> : vector<8x128xf32>
    %3 = tpu.matmul %0, %2, %cst {dimension_numbers = #tpu.dot_dimension_numbers<[1], [0], [0], [1], [0, 0, 1, 1], [], []>} : vector<8x32xf32>, vector<32x128xf32>, vector<8x128xf32> -> vector<8x128xf32>
    %c0_3 = arith.constant 0 : index
    %c0_4 = arith.constant 0 : index
    %4 = vector.load %arg3[%c0_3, %c0_4] : memref<1x128xf32, #tpu.memory_space<vmem>>, vector<1x128xf32>
    %5 = vector.broadcast %4 : vector<1x128xf32> to vector<8x128xf32>
    %6 = arith.addf %3, %5 : vector<8x128xf32>
    %7 = arith.negf %6 : vector<8x128xf32>
    %8 = math.exp %7 : vector<8x128xf32>
    %cst_5 = arith.constant 1.000000e+00 : f32
    %9 = vector.broadcast %cst_5 : f32 to vector<8x128xf32>
    %10 = arith.addf %9, %8 : vector<8x128xf32>
    %11 = arith.divf %9, %10 : vector<8x128xf32>
    %12 = arith.mulf %6, %11 : vector<8x128xf32>
    %13 = arith.truncf %12 : vector<8x128xf32> to vector<8x128xbf16>
    %c0_6 = arith.constant 0 : index
    %c0_7 = arith.constant 0 : index
    %14 = vector.load %arg4[%c0_6, %c0_7] : memref<128x128xbf16, #tpu.memory_space<vmem>>, vector<128x128xbf16>
    %cst_8 = arith.constant dense<0.000000e+00> : vector<8x128xf32>
    %15 = tpu.matmul %13, %14, %cst_8 {dimension_numbers = #tpu.dot_dimension_numbers<[1], [0], [0], [1], [0, 0, 1, 1], [], []>} : vector<8x128xbf16>, vector<128x128xbf16>, vector<8x128xf32> -> vector<8x128xf32>
    %c0_9 = arith.constant 0 : index
    %c0_10 = arith.constant 0 : index
    %16 = vector.load %arg5[%c0_9, %c0_10] : memref<1x128xf32, #tpu.memory_space<vmem>>, vector<1x128xf32>
    %17 = vector.broadcast %16 : vector<1x128xf32> to vector<8x128xf32>
    %18 = arith.addf %15, %17 : vector<8x128xf32>
    %c0_11 = arith.constant 0 : index
    %c0_12 = arith.constant 0 : index
    %19 = vector.load %arg6[%c0_11, %c0_12] : memref<8x128xf32, #tpu.memory_space<vmem>>, vector<8x128xf32>
    tpu.vector_store %arg6[%c0_11, %c0_12], %18 {strides = array<i32>} : memref<8x128xf32, #tpu.memory_space<vmem>>, vector<8x128xf32>,
    return
  }
  func.func @transform_0(%arg0: i32) -> (i32, i32) {
    %c0_i32 = arith.constant 0 : i32
    %c0_i32_0 = arith.constant 0 : i32
    %c0_i32_1 = arith.constant 0 : i32
    return %c0_i32, %c0_i32_0 : i32, i32
  }
  func.func @transform_1(%arg0: i32) -> (i32, i32) {
    %c0_i32 = arith.constant 0 : i32
    %c0_i32_0 = arith.constant 0 : i32
    %c0_i32_1 = arith.constant 0 : i32
    return %c0_i32, %c0_i32_0 : i32, i32
  }
  func.func @transform_2(%arg0: i32) -> (i32, i32) {
    %c0_i32 = arith.constant 0 : i32
    %c0_i32_0 = arith.constant 0 : i32
    %c0_i32_1 = arith.constant 0 : i32
    return %c0_i32, %c0_i32_0 : i32, i32
  }
  func.func @transform_3(%arg0: i32) -> (i32, i32) {
    %c0_i32 = arith.constant 0 : i32
    %c0_i32_0 = arith.constant 0 : i32
    return %c0_i32, %arg0 : i32, i32
  }
  func.func @transform_4(%arg0: i32) -> (i32, i32) {
    %c0_i32 = arith.constant 0 : i32
    %c0_i32_0 = arith.constant 0 : i32
    return %c0_i32, %arg0 : i32, i32
  }
  func.func @transform_5(%arg0: i32) -> (i32, i32) {
    %c0_i32 = arith.constant 0 : i32
    %c0_i32_0 = arith.constant 0 : i32
    return %c0_i32, %arg0 : i32, i32
  }
}

</mosaic_0001>

<bundles_post_ra>
// kernel: tpu_custom_call.1
= control target key start
LH: loop header
LB: loop body
LE: loop exit
PB: predicated region body
PF: predicated region fallthrough
CT: control target
= control target key end

     0   :  { %10 = vsyncpa [#allocation3], 0  ;;  %s573_s0 = inlined_call_operand.hbm [shape: f32[8,32], index: 0, kind: input, shape index: {}]   ;;  %s574_s1 = inlined_call_operand.hbm [shape: bf16[32,128], index: 1, kind: input, shape index: {}]   ;;  %s575_s2 = inlined_call_operand.vmem [shape: f32[1,128], index: 2, kind: input, shape index: {}]   ;;  %s576_s3 = inlined_call_operand.hbm [shape: bf16[128,128], index: 3, kind: input, shape index: {}]   ;;  %s577_s4 = inlined_call_operand.vmem [shape: f32[1,128], index: 4, kind: input, shape index: {}]   ;;  %s578_s5 = inlined_call_operand.hbm [shape: f32[8,128], index: 5, kind: output, shape index: {}]  }
   0x1   :  { %11 = vsyncpa [#allocation6], 0 }
   0x2   :  { %12 = vsyncpa [#allocation4], 0  ;;  %s474_s18 = smov [#allocation5]   ;;  %s380_s22 = scalar_lea.hbm %s574_s1, 256 }
   0x3   :  { %s28_s19 = sshll.u32 %s474_s18, 4  ;;  %p381_p0 = scmp.ne.s32.totalorder %s574_s1, %s380_s22  ;;  %s29_s19 = int_to_ptr.vmem [resolvable:$true] %s28_s19 }
   0x4   :  { %p384_p1 = scmp.lt.u32.totalorder %s380_s22, %s574_s1 }
   0x6   :  { %p386_p2 = pnand %p384_p1, %p381_p0 }
   0x8   :  { %389 = shalt.err (!%p386_p2)
}
   0x9   :  { %s390_s27 = scalar_lea.vmem %s29_s19, 256  ;;  %p395_p4 = scmp.lt.s32.totalorder %s29_s19, %s29_s19 }
   0xa   :  { %p391_p3 = scmp.ne.s32.totalorder %s29_s19, %s390_s27  ;;  %p396_p5 = scmp.lt.s32.totalorder %s390_s27, %s390_s27 }
   0xc   :  { %p397_p6 = por %p396_p5, %p395_p4 }
   0xe   :  { %p398_p7 = pnand %p397_p6, %p391_p3 }
  0x10   :  { %401 = shalt.err (!%p398_p7)
}
  0x11   :  { %s475_s28 = smov 64   ;;  %s476_s29 = smov 4  }
  0x12   :  { %34 = dma.hbm_to_vmem [thread:$0]  %s574_s1, 256, %s29_s19, [#allocation6], %s475_s28, %s475_s28, %s476_s29  }
  0x13   :  { %s477_s7 = smov [#allocation2]   ;;  %s478_s9 = smov [#allocation7]  }
  0x14   :  { %s19_s8 = sshll.u32 %s477_s7, 4  ;;  %s42_s10 = sshll.u32 %s478_s9, 4  ;;  %s20_s8 = int_to_ptr.vmem [resolvable:$true] %s19_s8  ;;  %s43_s10 = int_to_ptr.vmem [resolvable:$true] %s42_s10 }
  0x15   :  { %s402_s13 = scalar_lea.hbm %s573_s0, 128 }
  0x16   :  { %p403_p8 = scmp.ne.s32.totalorder %s573_s0, %s402_s13  ;;  %p406_p9 = scmp.lt.u32.totalorder %s402_s13, %s573_s0 }
  0x18   :  { %p408_p10 = pnand %p406_p9, %p403_p8 }
  0x1a   :  { %411 = shalt.err (!%p408_p10)
}
  0x1b   :  { %s412_s1 = scalar_lea.vmem %s20_s8, 128  ;;  %p417_p12 = scmp.lt.s32.totalorder %s20_s8, %s20_s8 }
  0x1c   :  { %p413_p11 = scmp.ne.s32.totalorder %s20_s8, %s412_s1  ;;  %p418_p13 = scmp.lt.s32.totalorder %s412_s1, %s412_s1 }
  0x1e   :  { %p419_p0 = por %p418_p13, %p417_p12 }
  0x20   :  { %p420_p1 = pnand %p419_p0, %p413_p11 }
  0x22   :  { %423 = shalt.err (!%p420_p1)
}
  0x23   :  { %22 = dma.hbm_to_vmem [thread:$0]  %s573_s0, 128, %s20_s8, [#allocation3]  }
  0x24   :  { %s424_s22 = scalar_lea.hbm %s576_s3, 1024 }
  0x25   :  { %p425_p2 = scmp.ne.s32.totalorder %s576_s3, %s424_s22  ;;  %p428_p3 = scmp.lt.u32.totalorder %s424_s22, %s576_s3 }
  0x27   :  { %p430_p4 = pnand %p428_p3, %p425_p2 }
  0x29   :  { %433 = shalt.err (!%p430_p4)
}
  0x2a   :  { %s434_s27 = scalar_lea.vmem %s43_s10, 1024  ;;  %p439_p6 = scmp.lt.s32.totalorder %s43_s10, %s43_s10 }
  0x2b   :  { %p435_p5 = scmp.ne.s32.totalorder %s43_s10, %s434_s27  ;;  %p440_p7 = scmp.lt.s32.totalorder %s434_s27, %s434_s27 }
  0x2d   :  { %p441_p8 = por %p440_p7, %p439_p6 }
  0x2f   :  { %p442_p9 = pnand %p441_p8, %p435_p5 }
  0x31   :  { %445 = shalt.err (!%p442_p9)
}
  0x32   :  { %48 = dma.hbm_to_vmem [thread:$0]  %s576_s3, 1024, %s43_s10, [#allocation6], %s475_s28, %s475_s28, %s476_s29  }
  0x33   :  { %468 = dma.done.wait [#allocation3], 128  }
  0x34   :  { %469 = vsyncadd [#allocation3], 4294967168 }
  0x35   :  { %470 = dma.done.wait [#allocation6], 1280  }
  0x36   :  { %471 = vsyncadd [#allocation6], 4294966016  ;;  %v479_v0 = vmov 0.0|0.0   ;;  %vm480_vm0 = vmmov 0   ;;  %v481_v1 = vmov 0.0   ;;  %v300_v2 = vld [vmem:[#allocation5] sm:$0xff]  }
  0x37   :  { %353 = vmatprep.subr.bf16.mxu0 %v479_v0  ;;  %330 = vmatprep.mubr.msk.f32.mxu0 %vm480_vm0, %v481_v1  ;;  %v307_v3 = vld [vmem:[#allocation5 + $0x8] sm:$0xff]   ;;  %vm77_vm1 = vcmask 261120   ;;  %v61_v4 = vld [vmem:[#allocation2] sm:$0xff]  ;;  %v368_v5 = vld [vmem:[#allocation7] sm:$0xff]   ;;  %s482_s7 = smov [#allocation8]  }
  0x38   :  { %333 = vmatprep.subr.bf16.mxu1 %v481_v1  ;;  %349 = vmatprep.mubr.msk.bf16.mxu1 %vm480_vm0, %v481_v1  ;;  %v369_v6 = vld [vmem:[#allocation7 + $0x8] sm:$0xff]   ;;  %v370_v7 = vld [vmem:[#allocation7 + $0x10] sm:$0xff]   ;;  %v371_v8 = vld [vmem:[#allocation7 + $0x18] sm:$0xff]   ;;  %s277_s8 = sshll.u32 %s482_s7, 4  ;;  %s278_s8 = int_to_ptr.vmem [resolvable:$true] %s277_s8 }
  0x39   :  { %355 = vmatpush3.bf16.msra.mxu0 %v300_v2  ;;  %334 = vmatpush3.bf16.msra.mxu1 %v368_v5  ;;  %v372_v9 = vld [vmem:[#allocation7 + $0x20] sm:$0xff]   ;;  %v373_v10 = vld [vmem:[#allocation7 + $0x28] sm:$0xff]   ;;  %v374_v11 = vld [vmem:[#allocation7 + $0x30] sm:$0xff]   ;;  %p451_p11 = scmp.lt.s32.totalorder %s278_s8, %s278_s8 }
  0x3a   :  { %356 = vmatprep.subr.bf16.mxu0 %v479_v0  ;;  %335 = vmatprep.subr.bf16.mxu1 %v481_v1  ;;  %v375_v12 = vld [vmem:[#allocation7 + $0x38] sm:$0xff]   ;;  %v287_v13 = vld [vmem:[%s575_s2] ss:$0 sm:$0xff]  ;;  %s446_s2 = scalar_lea.vmem %s278_s8, 128 }
  0x3b   :  { %v290_v23 = vld [vmem:[%s577_s4] ss:$0 sm:$0xff]  ;;  %p447_p10 = scmp.ne.s32.totalorder %s278_s8, %s446_s2  ;;  %p452_p12 = scmp.lt.s32.totalorder %s446_s2, %s446_s2 }
  0x3d   :  { %358 = vmatpush3.bf16.msra.mxu0 %v307_v3  ;;  %336 = vmatpush3.bf16.msra.mxu1 %v369_v6  ;;  %p453_p13 = por %p452_p12, %p451_p11 }
  0x3e   :  { %337 = vmatprep.subr.bf16.mxu1 %v481_v1 }
  0x3f   :  { %p454_p0 = pnand %p453_p13, %p447_p10 }
  0x40   :  { %331 = vmatmul.mubr.msk.f32.vlgmr.msra.gmra.mrb[0].mxu0 %vm77_vm1, %v61_v4 }
  0x41   :  { %338 = vmatpush3.bf16.msra.mxu1 %v370_v7 }
  0x42   :  { %339 = vmatprep.subr.bf16.mxu1 %v481_v1 }
  0x45   :  { %340 = vmatpush3.bf16.msra.mxu1 %v371_v8 }
  0x46   :  { %341 = vmatprep.subr.bf16.mxu1 %v481_v1 }
  0x49   :  { %342 = vmatpush3.bf16.msra.mxu1 %v372_v9 }
  0x4a   :  { %343 = vmatprep.subr.bf16.mxu1 %v481_v1 }
  0x4d   :  { %344 = vmatpush3.bf16.msra.mxu1 %v373_v10 }
  0x4e   :  { %345 = vmatprep.subr.bf16.mxu1 %v481_v1 }
  0x51   :  { %346 = vmatpush3.bf16.msra.mxu1 %v374_v11 }
  0x52   :  { %347 = vmatprep.subr.bf16.mxu1 %v481_v1 }
  0x55   :  { %348 = vmatpush3.bf16.msra.mxu1 %v375_v12 }
 0x113   :  { %v147_v14 = vpop.f32.mrb[0].mxu0 }
 0x114   :  { %v148_v15 = vadd.f32 %v287_v13, %v147_v14  ;;  %v332_v16 = vpop.f32.mrb[1].mxu0 }
 0x116   :  { %v289_v17 = vmul.f32 -1.442695, %v148_v15 }
 0x118   :  { %376 = vpow2.f32 %v289_v17 }
 0x122   :  { %v377_v18 = vpop.eup %376 }
 0x123   :  { %v154_v19 = vadd.f32 1.0, %v377_v18 }
 0x125   :  { %378 = vrcp.f32 %v154_v19 }
 0x12f   :  { %v379_v20 = vpop.eup %378 }
 0x130   :  { %v157_v21 = vmul.f32 %v379_v20, %v148_v15 }
 0x132   :  { %v158_v22 = vpack.c.bf16 %v157_v21, %v157_v21 }
 0x134   :  { %350 = vmatmul.mubr.bf16.vlgmr.msra.gmra.mrb[0].mxu1 %v158_v22 }
 0x207   :  { %v264_v24 = vpop.f32.mrb[0].mxu1 }
 0x208   :  { %v265_v25 = vadd.f32 %v290_v23, %v264_v24  ;;  %v351_v26 = vpop.f32.mrb[1].mxu1 }
 0x209   :  { %v267_v27 = vpop.f32.mrb[2].mxu1 }
 0x20a   :  { %270 = vst [vmem:[#allocation8] sm:$0xff] %v265_v25  ;;  %v352_v28 = vpop.f32.mrb[3].mxu1 }
 0x20b   :  { %457 = shalt.err (!%p454_p0)
}
 0x20c   :  { %s458_s4 = scalar_lea.hbm %s578_s5, 128 }
 0x20d   :  { %p459_p1 = scmp.ne.s32.totalorder %s578_s5, %s458_s4  ;;  %p462_p2 = scmp.lt.u32.totalorder %s458_s4, %s578_s5 }
 0x20f   :  { %p464_p3 = pnand %p462_p2, %p459_p1 }
 0x211   :  { %467 = shalt.err (!%p464_p3)
}
 0x212   :  { %280 = dma.vmem_to_hbm [thread:$0]  %s278_s8, 128, %s578_s5, [#allocation4]  }
 0x213   :  { %472 = dma.done.wait [#allocation4], 128  }
 0x214   :  { %473 = vsyncadd [#allocation4], 4294967168 }
 0x215   :  { %284 = vsyncpa [#allocation3], 1 }
 0x216   :  { %285 = vsyncpa [#allocation6], 1 }
 0x217   :  { %286 = vsyncpa [#allocation4], 1 }

</bundles_post_ra>
